<compile_context>
chip_gen: v7x
topology: tpu7x:2x2x1
jax: 0.10.0
libtpu: 0.0.40
codegen_flags: <defaults>
</compile_context>

<pallas_src>
import functools

import jax
import jax.numpy as jnp
from jax import lax
from jax.experimental import pallas as pl
from jax.experimental.pallas import tpu as pltpu

_LANE = 128
_CLAMP = 1e-15
_VMEM_BUDGET = 40 << 20   # keep the per-step footprint under ~40 MiB (v7x: 64 MiB phys)
_VMEM_LIMIT = 48 << 20    # scoped-VMEM limit handed to Mosaic (v5e default is 16 MiB)
_ELEM_BUDGET = 1 << 20    # ~1M elements (~4 MiB f32) per input block per step


def _round_up(x, m):
    return (x + m - 1) // m * m


def _mxu_is_256():
    """True on chips with a 256x256 MXU tile (v6e / v7x); False on v5e/older/unknown."""
    try:
        kind = jax.devices()[0].device_kind.lower()
    except Exception:
        return False
    return any(tag in kind for tag in ("v6", "v7", "tpu7"))


def _triu_ones(n):
    """Upper-triangular ones (i <= j): cumsum along lanes == x @ triu."""
    row = lax.broadcasted_iota(jnp.int32, (n, n), 0)
    col = lax.broadcasted_iota(jnp.int32, (n, n), 1)
    return (row <= col).astype(jnp.float32)


def _emd_kernel(*refs, r, has_weight, blk, c_true, c_pad, nblk):
    """Samplewise EMD for one (TB, C_pad) batch tile.

    refs = (tri_ref, pt_ref, pe_ref[, w_ref], out_ref)
      tri_ref        : (blk, blk) f32 upper-triangular ones (resident, constant
                       index_map — DMA'd once, reused every grid step)
      pt_ref, pe_ref : (TB, C_pad) target / estimate distributions (any float dtype)
      w_ref          : (TB, 1) per-sample weight (only when has_weight)
      out_ref        : (TB, 1) samplewise EMD (f32)
    """
    if has_weight:
        tri_ref, pt_ref, pe_ref, w_ref, out_ref = refs
    else:
        tri_ref, pt_ref, pe_ref, out_ref = refs
        w_ref = None

    tb = pt_ref.shape[0]

    def block_diff(start):
        # Upcast + subtract per block: no full (TB, C) f32 intermediate.
        return (pe_ref[:, pl.ds(start, blk)].astype(jnp.float32)
                - pt_ref[:, pl.ds(start, blk)].astype(jnp.float32))

    def block_pow(cdf):
        a = jnp.abs(cdf)
        if r == 1:
            return a
        a = jnp.maximum(a, _CLAMP)
        if r == 2:
            return a * a
        return a ** r

    def step(start, carry):
        d = block_diff(start)
        cdf = jnp.dot(d, tri_ref[...], preferred_element_type=jnp.float32) + carry
        # Running carry = last lane of the block cdf (no extra cross-lane reduce).
        return block_pow(cdf), cdf[:, blk - 1:blk]

    if nblk == 1 and c_pad == c_true:
        # Single aligned block (covers C <= 128 and C == blk exactly).
        cdf = jnp.dot(block_diff(0), tri_ref[...], preferred_element_type=jnp.float32)
        acc = jnp.sum(block_pow(cdf), axis=-1, keepdims=True)
    else:
        acc_vec = jnp.zeros((tb, blk), jnp.float32)   # per-lane accumulator
        carry = jnp.zeros((tb, 1), jnp.float32)
        n_main = nblk - 1                             # last block handled in epilogue

        if n_main >= 8:
            def body(j, state):
                acc_v, car = state
                start = pl.multiple_of(j * blk, blk)
                p, car = step(start, car)
                return acc_v + p, car
            acc_vec, carry = lax.fori_loop(0, n_main, body, (acc_vec, carry),
                                           unroll=4)
        else:
            for j in range(n_main):
                p, carry = step(j * blk, carry)
                acc_vec = acc_vec + p

        # Epilogue: last block; mask padded lanes before accumulation.
        p, _ = step((nblk - 1) * blk, carry)
        if c_pad != c_true:
            lane = lax.broadcasted_iota(jnp.int32, (tb, blk), 1)
            p = jnp.where(lane < (c_true - (nblk - 1) * blk), p, 0.0)
        acc_vec = acc_vec + p

        # Single cross-lane reduction for the whole tile.
        acc = jnp.sum(acc_vec, axis=-1, keepdims=True)

    mean = acc * (1.0 / c_true)
    if r == 1:
        samplewise = mean
    elif r == 2:
        samplewise = jnp.sqrt(mean)
    else:
        samplewise = mean ** (1.0 / r)

    if has_weight:
        samplewise = samplewise * w_ref[...].astype(jnp.float32)
    out_ref[...] = samplewise


def _vmem_estimate(tb, c_pad, itemsize, blk):
    """Rough per-step VMEM footprint: double-buffered inputs + f32 intermediates."""
    ins = 2 * 2 * tb * c_pad * itemsize      # pt/pe, double-buffered
    tri = 2 * blk * blk * 4                  # resident triangular operator
    inter = 6 * tb * blk * 4                 # diff, cdf, pow, acc_vec, temporaries
    outs = 2 * tb * 4 * 2                    # out (+ weight), double-buffered
    return ins + tri + inter + outs


def emd_loss(p_target, p_estimate, weight=None, reduction='mean', r=2):
    assert p_target.shape == p_estimate.shape, (
        'target {} vs. predict {}'.format(p_target.shape, p_estimate.shape))
    B, C = p_target.shape
    has_weight = weight is not None

    itemsize = jnp.dtype(p_target.dtype).itemsize
    # native sublane packing: f32 -> 8, bf16/f16 -> 16, int8/fp8 -> 32
    sub = 8 if itemsize >= 4 else (16 if itemsize == 2 else 32)

    # --- cumsum block width and lane padding -------------------------------
    if C <= _LANE:
        blk, c_pad = C, C                      # small dense path, full-dim block
    else:
        c_pad = _round_up(C, _LANE)            # minimal padding (keeps HBM traffic low)
        blk = 256 if (c_pad % 256 == 0 and _mxu_is_256()) else _LANE
    nblk = max(c_pad // blk, 1)

    # --- batch tile sizing --------------------------------------------------
    B_sub = _round_up(B, sub)
    cap = max(sub, (_ELEM_BUDGET // max(c_pad, 1)) // sub * sub)  # ~1M elems / input block
    TB = max(sub, min(B_sub, cap))
    # Guarantee >= 2 grid steps when the batch permits (megacore / v7x 2 TCs).
    half = (B_sub // 2) // sub * sub
    if half >= sub:
        TB = min(TB, half)
    # Respect the VMEM budget (re-derived for v7x's smaller 64 MiB VMEM).
    while TB > sub and _vmem_estimate(TB, c_pad, itemsize, blk) > _VMEM_BUDGET:
        TB = max(sub, (TB // 2) // sub * sub)
    B_pad = _round_up(B, TB)

    def pad_2d(x):
        pr, pc = B_pad - B, c_pad - C
        if pr == 0 and pc == 0:
            return x
        return jnp.pad(x, ((0, pr), (0, pc)))

    # NOTE: no dtype cast here — the kernel upcasts in VMEM (halves bf16 DMA).
    pt = pad_2d(p_target)
    pe = pad_2d(p_estimate)
    tri = _triu_ones(blk)                      # built once; resident in VMEM

    args = [tri, pt, pe]
    in_specs = [
        pl.BlockSpec((blk, blk), lambda i: (0, 0)),       # tri, constant block
        pl.BlockSpec((TB, c_pad), lambda i: (i, 0)),      # p_target tile
        pl.BlockSpec((TB, c_pad), lambda i: (i, 0)),      # p_estimate tile
    ]
    if has_weight:
        w = jnp.asarray(weight, dtype=jnp.float32).reshape(B, 1)
        if B_pad != B:
            w = jnp.pad(w, ((0, B_pad - B), (0, 0)))
        args.append(w)
        in_specs.append(pl.BlockSpec((TB, 1), lambda i: (i, 0)))

    flops = 2 * B_pad * c_pad * blk
    bytes_accessed = 2 * B_pad * c_pad * itemsize + B_pad * 4 + blk * blk * 4
    if has_weight:
        bytes_accessed += B_pad * 4

    samplewise = pl.pallas_call(
        functools.partial(_emd_kernel, r=r, has_weight=has_weight,
                          blk=blk, c_true=C, c_pad=c_pad, nblk=nblk),
        out_shape=jax.ShapeDtypeStruct((B_pad, 1), jnp.float32),
        grid=(B_pad // TB,),
        in_specs=in_specs,
        out_specs=pl.BlockSpec((TB, 1), lambda i: (i, 0)),
        compiler_params=pltpu.CompilerParams(
            dimension_semantics=("parallel",),
            vmem_limit_bytes=_VMEM_LIMIT),
        cost_estimate=pl.CostEstimate(
            flops=flops,
            transcendentals=0 if r == 1 else B_pad,
            bytes_accessed=bytes_accessed),
    )(*args)

    samplewise = samplewise[:B, 0]
    if reduction == 'sum':
        return jnp.sum(samplewise)
    elif reduction is None:
        return samplewise
    else:  # 'mean' (default)
        return jnp.mean(samplewise)


def _reference_emd(p_target, p_estimate, weight=None, reduction='mean', r=2):
    """Pure-JAX mirror of the PyTorch forward, for verification."""
    p_target = p_target.astype(jnp.float32)
    p_estimate = p_estimate.astype(jnp.float32)
    cdf_t = jnp.cumsum(p_target, axis=-1)
    cdf_e = jnp.cumsum(p_estimate, axis=-1)
    cdf_diff = cdf_e - cdf_t
    if r == 1:
        samplewise = jnp.mean(jnp.abs(cdf_diff), axis=-1)
    else:
        ad = jnp.abs(cdf_diff)
        ad = jnp.where(ad > 1e-15, ad, 1e-15)
        samplewise = jnp.mean(ad ** r, axis=-1) ** (1.0 / r)
    if weight is not None:
        samplewise = samplewise * weight
    if reduction == 'sum':
        return jnp.sum(samplewise)
    elif reduction is None:
        return samplewise
    return jnp.mean(samplewise)


if __name__ == "__main__":
    key = jax.random.PRNGKey(0)
    k1, k2, k3, k4, k5, k6, k7 = jax.random.split(key, 7)

    # --- small dense-path case: B=8 samples, 16-bin distributions ---
    B, C = 8, 16
    p_target = jax.nn.softmax(jax.random.normal(k1, (B, C), jnp.float32), axis=-1)
    p_estimate = jax.nn.softmax(jax.random.normal(k2, (B, C), jnp.float32), axis=-1)
    weight = jax.random.uniform(k3, (B,), jnp.float32, 0.5, 1.5)

    out = emd_loss(p_target, p_estimate)                       # mean, r=2
    jax.block_until_ready(out)
    ref = _reference_emd(p_target, p_estimate)
    assert jnp.allclose(out, ref, atol=1e-5, rtol=1e-5), (out, ref)

    out_w = emd_loss(p_target, p_estimate, weight=weight, reduction='sum')
    jax.block_until_ready(out_w)
    ref_w = _reference_emd(p_target, p_estimate, weight=weight, reduction='sum')
    assert jnp.allclose(out_w, ref_w, atol=1e-5, rtol=1e-5), (out_w, ref_w)

    out_n = emd_loss(p_target, p_estimate, reduction=None, r=1)
    jax.block_until_ready(out_n)
    ref_n = _reference_emd(p_target, p_estimate, reduction=None, r=1)
    assert jnp.allclose(out_n, ref_n, atol=1e-5, rtol=1e-5), (out_n, ref_n)

    # --- blocked-cumsum path: C = 256 (aligned, 1 or 2 blocks) ---
    Cb = 256
    pt_b = jax.nn.softmax(jax.random.normal(k4, (B, Cb), jnp.float32), axis=-1)
    pe_b = jax.nn.softmax(jax.random.normal(k5, (B, Cb), jnp.float32), axis=-1)
    out_b = emd_loss(pt_b, pe_b)
    jax.block_until_ready(out_b)
    ref_b = _reference_emd(pt_b, pe_b)
    assert jnp.allclose(out_b, ref_b, atol=1e-5, rtol=1e-5), (out_b, ref_b)

    # --- non-aligned C > 128: padded lanes masked in-kernel (C = 200) ---
    Cn = 200
    pt_n2 = jax.nn.softmax(jax.random.normal(k6, (B, Cn), jnp.float32), axis=-1)
    pe_n2 = jax.nn.softmax(jax.random.normal(k7, (B, Cn), jnp.float32), axis=-1)
    out_p = emd_loss(pt_n2, pe_n2)
    jax.block_until_ready(out_p)
    ref_p = _reference_emd(pt_n2, pe_n2)
    assert jnp.allclose(out_p, ref_p, atol=1e-5, rtol=1e-5), (out_p, ref_p)

    # --- large C: exercises the fori_loop blocked path (C = 2304) ---
    Cl = 2304
    pt_l = jax.nn.softmax(jax.random.normal(k4, (B, Cl), jnp.float32), axis=-1)
    pe_l = jax.nn.softmax(jax.random.normal(k5, (B, Cl), jnp.float32), axis=-1)
    out_l = emd_loss(pt_l, pe_l)
    jax.block_until_ready(out_l)
    ref_l = _reference_emd(pt_l, pe_l)
    assert jnp.allclose(out_l, ref_l, atol=3e-5, rtol=1e-4), (out_l, ref_l)

    # --- ragged batch (padding path): B=5 ---
    out_r = emd_loss(p_target[:5], p_estimate[:5], reduction=None)
    jax.block_until_ready(out_r)
    ref_r = _reference_emd(p_target[:5], p_estimate[:5], reduction=None)
    assert jnp.allclose(out_r, ref_r, atol=1e-5, rtol=1e-5), (out_r, ref_r)

    # --- bf16 inputs (kernel upcasts in VMEM; no wrapper cast) ---
    Bh, Ch = 16, 32
    pt_h = jax.nn.softmax(jax.random.normal(k1, (Bh, Ch), jnp.float32), axis=-1
                          ).astype(jnp.bfloat16)
    pe_h = jax.nn.softmax(jax.random.normal(k2, (Bh, Ch), jnp.float32), axis=-1
                          ).astype(jnp.bfloat16)
    out_h = emd_loss(pt_h, pe_h)
    jax.block_until_ready(out_h)
    ref_h = _reference_emd(pt_h, pe_h)
    assert jnp.allclose(out_h, ref_h, atol=1e-5, rtol=1e-5), (out_h, ref_h)

    print("KERNEL_OK")
</pallas_src>

<mosaic_0001>
module attributes {stable_mosaic.version = 11 : i64} {
  func.func @_emd_kernel(%arg0: i32, %arg1: memref<16x16xf32, #tpu.memory_space<vmem>>, %arg2: memref<8x16xf32, #tpu.memory_space<vmem>>, %arg3: memref<8x16xf32, #tpu.memory_space<vmem>>, %arg4: memref<8x1xf32, #tpu.memory_space<vmem>>) attributes {dimension_semantics = [#tpu.dimension_semantics<parallel>], iteration_bounds = array<i64: 1>, scalar_prefetch = 0 : i64, scratch_operands = 0 : i64, tpu.core_type = #tpu.core_type<tc>, window_params = [{pipeline_mode = #tpu.pipeline_mode<synchronous>, transform_indices = @transform_0, window_bounds = array<i64: 16, 16>}, {transform_indices = @transform_1, window_bounds = array<i64: 8, 16>}, {transform_indices = @transform_2, window_bounds = array<i64: 8, 16>}, {transform_indices = @transform_3, window_bounds = array<i64: 8, 1>}]} {
    %c0 = arith.constant 0 : index
    %c0_0 = arith.constant 0 : index
    %0 = vector.load %arg3[%c0, %c0_0] : memref<8x16xf32, #tpu.memory_space<vmem>>, vector<8x16xf32>
    %c0_1 = arith.constant 0 : index
    %c0_2 = arith.constant 0 : index
    %1 = vector.load %arg2[%c0_1, %c0_2] : memref<8x16xf32, #tpu.memory_space<vmem>>, vector<8x16xf32>
    %2 = arith.subf %0, %1 : vector<8x16xf32>
    %c0_3 = arith.constant 0 : index
    %c0_4 = arith.constant 0 : index
    %3 = vector.load %arg1[%c0_3, %c0_4] : memref<16x16xf32, #tpu.memory_space<vmem>>, vector<16x16xf32>
    %cst = arith.constant dense<0.000000e+00> : vector<8x16xf32>
    %4 = tpu.matmul %2, %3, %cst {dimension_numbers = #tpu.dot_dimension_numbers<[1], [0], [0], [1], [0, 0, 1, 1], [], []>} : vector<8x16xf32>, vector<16x16xf32>, vector<8x16xf32> -> vector<8x16xf32>
    %5 = math.absf %4 : vector<8x16xf32>
    %cst_5 = arith.constant 1.000000e-15 : f32
    %6 = vector.broadcast %cst_5 : f32 to vector<8x16xf32>
    %7 = arith.maximumf %5, %6 : vector<8x16xf32>
    %8 = arith.mulf %7, %7 : vector<8x16xf32>
    %cst_6 = arith.constant dense<0.000000e+00> : vector<8xf32>
    %9 = vector.multi_reduction <add>, %8, %cst_6 [1] : vector<8x16xf32> to vector<8xf32>
    %10 = vector.shape_cast %9 : vector<8xf32> to vector<8x1xf32>
    %cst_7 = arith.constant 6.250000e-02 : f32
    %11 = vector.broadcast %cst_7 : f32 to vector<8x1xf32>
    %12 = arith.mulf %10, %11 : vector<8x1xf32>
    %13 = math.sqrt %12 : vector<8x1xf32>
    %c0_8 = arith.constant 0 : index
    %c0_9 = arith.constant 0 : index
    %14 = vector.load %arg4[%c0_8, %c0_9] : memref<8x1xf32, #tpu.memory_space<vmem>>, vector<8x1xf32>
    tpu.vector_store %arg4[%c0_8, %c0_9], %13 {strides = array<i32>} : memref<8x1xf32, #tpu.memory_space<vmem>>, vector<8x1xf32>,
    return
  }
  func.func @transform_0(%arg0: i32) -> (i32, i32) {
    %c0_i32 = arith.constant 0 : i32
    %c0_i32_0 = arith.constant 0 : i32
    %c0_i32_1 = arith.constant 0 : i32
    return %c0_i32, %c0_i32_0 : i32, i32
  }
  func.func @transform_1(%arg0: i32) -> (i32, i32) {
    %c0_i32 = arith.constant 0 : i32
    %c0_i32_0 = arith.constant 0 : i32
    return %arg0, %c0_i32 : i32, i32
  }
  func.func @transform_2(%arg0: i32) -> (i32, i32) {
    %c0_i32 = arith.constant 0 : i32
    %c0_i32_0 = arith.constant 0 : i32
    return %arg0, %c0_i32 : i32, i32
  }
  func.func @transform_3(%arg0: i32) -> (i32, i32) {
    %c0_i32 = arith.constant 0 : i32
    %c0_i32_0 = arith.constant 0 : i32
    return %arg0, %c0_i32 : i32, i32
  }
}

</mosaic_0001>

<bundles_post_ra>
// kernel: tpu_custom_call.1
= control target key start
LH: loop header
LB: loop body
LE: loop exit
PB: predicated region body
PF: predicated region fallthrough
CT: control target
= control target key end

     0   :  { %8 = vsyncpa [#allocation3], 0  ;;  %s320_s0 = inlined_call_operand.hbm [shape: f32[16,16], index: 0, kind: input, shape index: {}]   ;;  %s321_s1 = inlined_call_operand.hbm [shape: f32[8,16], index: 1, kind: input, shape index: {}]   ;;  %s322_s2 = inlined_call_operand.hbm [shape: f32[8,16], index: 2, kind: input, shape index: {}]   ;;  %s323_s3 = inlined_call_operand.vmem [shape: f32[8,1], index: 3, kind: output, shape index: {}]  }
   0x1   :  { %9 = vsyncpa [#allocation5], 0  ;;  %s246_s12 = smov [#allocation4]   ;;  %s247_s14 = smov [#allocation2]  }
   0x2   :  { %s28_s13 = sshll.u32 %s246_s12, 4  ;;  %s15_s15 = sshll.u32 %s247_s14, 4  ;;  %s29_s13 = int_to_ptr.vmem [resolvable:$true] %s28_s13  ;;  %s274_s15 = int_to_ptr.vmem [resolvable:$true] %s15_s15 }
   0x3   :  { %s176_s18 = scalar_lea.hbm %s321_s1, 128 }
   0x4   :  { %p177_p0 = scmp.ne.s32.totalorder %s321_s1, %s176_s18  ;;  %p180_p1 = scmp.lt.u32.totalorder %s176_s18, %s321_s1 }
   0x6   :  { %p182_p2 = pnand %p180_p1, %p177_p0 }
   0x8   :  { %185 = shalt.err (!%p182_p2)
}
   0x9   :  { %s186_s23 = scalar_lea.vmem %s29_s13, 128  ;;  %p191_p4 = scmp.lt.s32.totalorder %s29_s13, %s29_s13 }
   0xa   :  { %p187_p3 = scmp.ne.s32.totalorder %s29_s13, %s186_s23  ;;  %p192_p5 = scmp.lt.s32.totalorder %s186_s23, %s186_s23 }
   0xc   :  { %p193_p6 = por %p192_p5, %p191_p4 }
   0xe   :  { %p194_p7 = pnand %p193_p6, %p187_p3 }
  0x10   :  { %197 = shalt.err (!%p194_p7)
}
  0x11   :  { %31 = dma.hbm_to_vmem [thread:$0]  %s321_s1, 128, %s29_s13, [#allocation5]  }
  0x12   :  { %s198_s28 = scalar_lea.hbm %s320_s0, 256 }
  0x13   :  { %p199_p8 = scmp.ne.s32.totalorder %s320_s0, %s198_s28  ;;  %p202_p9 = scmp.lt.u32.totalorder %s198_s28, %s320_s0 }
  0x15   :  { %p204_p10 = pnand %p202_p9, %p199_p8 }
  0x17   :  { %207 = shalt.err (!%p204_p10)
}
  0x18   :  { %s208_s6 = scalar_lea.vmem %s274_s15, 256  ;;  %p213_p12 = scmp.lt.s32.totalorder %s274_s15, %s274_s15 }
  0x19   :  { %p209_p11 = scmp.ne.s32.totalorder %s274_s15, %s208_s6  ;;  %p214_p13 = scmp.lt.s32.totalorder %s208_s6, %s208_s6 }
  0x1b   :  { %p215_p0 = por %p214_p13, %p213_p12 }
  0x1d   :  { %p216_p1 = pnand %p215_p0, %p209_p11 }
  0x1f   :  { %219 = shalt.err (!%p216_p1)
}
  0x20   :  { %s248_s1 = smov 128   ;;  %s249_s7 = smov 8  }
  0x21   :  { %21 = dma.hbm_to_vmem [thread:$0]  %s320_s0, 256, %s274_s15, [#allocation3], %s248_s1, %s248_s1, %s249_s7  }
  0x22   :  { %s250_s10 = smov [#allocation6]   ;;  %s220_s14 = scalar_lea.hbm %s322_s2, 128 }
  0x23   :  { %s38_s11 = sshll.u32 %s250_s10, 4  ;;  %p221_p2 = scmp.ne.s32.totalorder %s322_s2, %s220_s14  ;;  %s39_s11 = int_to_ptr.vmem [resolvable:$true] %s38_s11 }
  0x24   :  { %p224_p3 = scmp.lt.u32.totalorder %s220_s14, %s322_s2 }
  0x26   :  { %p226_p4 = pnand %p224_p3, %p221_p2 }
  0x28   :  { %229 = shalt.err (!%p226_p4)
}
  0x29   :  { %s230_s20 = scalar_lea.vmem %s39_s11, 128  ;;  %p235_p6 = scmp.lt.s32.totalorder %s39_s11, %s39_s11 }
  0x2a   :  { %p231_p5 = scmp.ne.s32.totalorder %s39_s11, %s230_s20  ;;  %p236_p7 = scmp.lt.s32.totalorder %s230_s20, %s230_s20 }
  0x2c   :  { %p237_p8 = por %p236_p7, %p235_p6 }
  0x2e   :  { %p238_p9 = pnand %p237_p8, %p231_p5 }
  0x30   :  { %241 = shalt.err (!%p238_p9)
}
  0x31   :  { %41 = dma.hbm_to_vmem [thread:$0]  %s322_s2, 128, %s39_s11, [#allocation5]  }
  0x32   :  { %242 = dma.done.wait [#allocation3], 256  }
  0x33   :  { %243 = vsyncadd [#allocation3], 4294967040 }
  0x34   :  { %244 = dma.done.wait [#allocation5], 256  }
  0x35   :  { %245 = vsyncadd [#allocation5], 4294967040  ;;  %v251_v0 = vmov 0.0|0.0   ;;  %vm252_vm0 = vmmov 0   ;;  %v253_v1 = vmov 0.0   ;;  %v54_v2 = vld [vmem:[#allocation2] sm:$0xff] }
  0x36   :  { %163 = vmatprep.subr.bf16.mxu0 %v251_v0  ;;  %160 = vmatprep.mubr.msk.f32.mxu0 %vm252_vm0, %v253_v1  ;;  %v55_v3 = vld [vmem:[#allocation2 + $0x8] sm:$0xff]  ;;  %v51_v4 = vld [vmem:[#allocation6] sm:$0xff]  ;;  %v52_v6 = vld [vmem:[#allocation4] sm:$0xff]  ;;  %vm56_vm1 = vcmask 130048   ;;  %vm144_vm3 = vcmask 7168  }
  0x37   :  { %v164_v5 = vpack.c.bf16 %v55_v3, %v54_v2  ;;  %v53_v7 = vsub.f32 %v51_v4, %v52_v6 }
  0x39   :  { %165 = vmatpush3.bf16.msra.mxu0 %v164_v5 }
  0x3c   :  { %161 = vmatmul.mubr.msk.f32.vlgmr.msra.gmra.mrb[0].mxu0 %vm56_vm1, %v53_v7 }
 0x10f   :  { %v126_v8 = vpop.f32.mrb[0].mxu0 }
 0x110   :  { %v130_v9 = vand.u32 2147483647, %v126_v8  ;;  %v162_v10 = vpop.f32.mrb[1].mxu0 }
 0x112   :  { %v131_v11 = vmax.f32 %v130_v9, 1e-15 }
 0x114   :  { %v132_v12 = vmul.f32 %v131_v11, %v131_v11 }
 0x116   :  { %v133_v13 = vsel %vm56_vm1, %v132_v12, 0.0 }
 0x117   :  { %134 = vadd.xlane.f32.xlu0 %v133_v13 }
 0x1a4   :  { %v135_v14 = vpop.xlane.xlu0 %134 }
 0x1a5   :  { %v136_v15 = vmul.f32 0.0625, %v135_v14 }
 0x1a7   :  { %174 = vrsqrt.f32 %v136_v15  ;;  %vm139_vm2 = vcmp.eq.f32.partialorder %v136_v15, inf  ;;  %v142_v18 = vand.u32 2147483648, %v136_v15  ;;  %vm141_vm4 = vcmp.eq.f32.partialorder %v136_v15, 0.0 }
 0x1b1   :  { %v175_v16 = vpop.eup %174 }
 0x1b2   :  { %v138_v17 = vmul.f32 %v175_v16, %v136_v15 }
 0x1b4   :  { %v140_v19 = vsel %vm139_vm2, %v136_v15, %v138_v17 }
 0x1b5   :  { %v143_v20 = vsel %vm141_vm4, %v142_v18, %v140_v19 }
 0x1b6   :  { %145 = vst.msk [vmem:[%s323_s3] sm:$0xff] %vm144_vm3, %v143_v20 }
 0x1b7   :  { %150 = vsyncpa [#allocation3], 1 }
 0x1b8   :  { %151 = vsyncpa [#allocation5], 1 }

</bundles_post_ra>
